<compile_context>
chip_gen: v6e
topology: v6e:2x2x1
jax: 0.10.0
libtpu: 0.0.40
codegen_flags: <defaults>
</compile_context>

<pallas_src>
import functools

import jax
import jax.numpy as jnp
from jax.experimental import pallas as pl
from jax.experimental.pallas import tpu as pltpu


def _round_up(x, m):
    return -(-x // m) * m


def _weighted_softmax_loss_kernel(logits_ref, targets_ref, out_ref, *,
                                  b_total, tile_b, mask_rows):
    x = logits_ref[...].astype(jnp.float32)      # [tile_b, C]
    t = targets_ref[...].astype(jnp.float32)     # [tile_b, C]

    # row sums of the raw targets (+ masked_fill of zero rows)
    s_raw = jnp.sum(t, axis=1, keepdims=True)                    # [tile_b, 1]
    s_safe = jnp.where(s_raw == 0.0, 1e-6, s_raw)

    # numerically stable log-softmax pieces
    m = jnp.max(x, axis=1, keepdims=True)
    shifted = x - m
    lse = jnp.log(jnp.sum(jnp.exp(shifted), axis=1, keepdims=True))

    # single fused lane reduction:  sum_j [ t*log(t) - t*(x - max) ]
    # (xlogy via log(max(t, eps)): exact 0 at t == 0 for non-negative targets)
    fused = jnp.sum(t * (jnp.log(jnp.maximum(t, 1e-30)) - shifted),
                    axis=1, keepdims=True)                       # [tile_b, 1]

    # fused form of  sum_j kl_div(log_softmax, t/S)_j * S
    row_loss = fused + s_raw * (lse - jnp.log(s_safe))

    if mask_rows:
        # ragged batch tail: zero out rows that fall beyond the real batch
        rows = (pl.program_id(0) * tile_b
                + jax.lax.broadcasted_iota(jnp.int32, row_loss.shape, 0))
        row_loss = jnp.where(rows < b_total, row_loss, 0.0)

    # lane-dense store of the per-tile partial sum (unmasked (8,128) vreg)
    out_ref[...] = jnp.full(out_ref.shape, jnp.sum(row_loss),
                            dtype=out_ref.dtype)


def weighted_softmax_loss(logits, targets, *, tile_b=None):
    """logits: [B, C], targets: [B, C] -> scalar loss (float32)."""
    assert logits.ndim == 2 and logits.shape == targets.shape
    B, C = logits.shape
    itemsize = max(jnp.dtype(logits.dtype).itemsize,
                   jnp.dtype(targets.dtype).itemsize)

    if tile_b is None:
        # ~2 MiB per input block -> 2 inputs x 2 pipeline buffers ~ 8 MiB VMEM,
        # within default scoped limits on v5e (16 MiB) / v6e / v7x (32 MiB).
        block_budget = 2 * 1024 * 1024
        tile_b = block_budget // max(1, C * itemsize)
        tile_b = min(2048, tile_b)
    # sublane-align and never tile past the (rounded) batch
    tile_b = max(8, min((tile_b // 8) * 8, _round_up(B, 8)))
    # keep >= 2 grid steps so both v7x TensorCores get DMA/compute work
    if tile_b >= B and B > 8:
        tile_b = max(8, _round_up(-(-B // 2), 8))

    num_tiles = -(-B // tile_b)
    mask_rows = (B % tile_b) != 0

    kernel = functools.partial(_weighted_softmax_loss_kernel,
                               b_total=B, tile_b=tile_b, mask_rows=mask_rows)

    cost = pl.CostEstimate(
        flops=8 * B * C,
        transcendentals=2 * B * C,
        bytes_accessed=2 * B * C * itemsize + num_tiles * 8 * 128 * 4,
    )

    partials = pl.pallas_call(
        kernel,
        out_shape=jax.ShapeDtypeStruct((num_tiles, 8, 128), jnp.float32),
        grid=(num_tiles,),
        in_specs=[
            pl.BlockSpec((tile_b, C), lambda i: (i, 0)),
            pl.BlockSpec((tile_b, C), lambda i: (i, 0)),
        ],
        out_specs=pl.BlockSpec((1, 8, 128), lambda i: (i, 0, 0)),
        compiler_params=pltpu.CompilerParams(
            dimension_semantics=("parallel",),
            vmem_limit_bytes=32 * 1024 * 1024,
        ),
        cost_estimate=cost,
    )(logits, targets)

    # tiny cross-tile reduction + mean over the original batch size
    return jnp.sum(partials[:, 0, 0]) / B


def _reference(logits, targets):
    # pure-JAX reference of the PyTorch forward, for sanity checking
    logits = logits.astype(jnp.float32)
    targets = targets.astype(jnp.float32)
    tar_sum = jnp.sum(targets, axis=1, keepdims=True)
    tar_sum = jnp.where(tar_sum == 0.0, 1e-6, tar_sum)
    tar = targets / tar_sum
    log_sm = jax.nn.log_softmax(logits, axis=1)
    xlogy = jnp.where(tar == 0.0, 0.0, tar * jnp.log(tar))
    kl = xlogy - tar * log_sm
    loss = jnp.sum(kl, axis=1, keepdims=True) * tar_sum
    return jnp.sum(loss) / logits.shape[0]


if __name__ == "__main__":
    # WeightedSoftmaxLoss has no parameters; only inputs are needed.
    key = jax.random.PRNGKey(0)

    # --- test 1: aligned shapes, includes an all-zero target row ------------
    B, C = 8, 32
    k_logits, k_targets, key = jax.random.split(key, 3)
    logits = jax.random.normal(k_logits, (B, C), dtype=jnp.float32)
    targets = jax.nn.relu(jax.random.normal(k_targets, (B, C), dtype=jnp.float32))
    targets = targets.at[3].set(0.0)   # exercise the masked_fill path

    loss = weighted_softmax_loss(logits, targets)
    jax.block_until_ready(loss)
    ref = _reference(logits, targets)
    assert jnp.allclose(loss, ref, rtol=1e-4, atol=1e-4), (loss, ref)

    # --- test 2: ragged batch (B % tile_b != 0) and C % 128 != 0 ------------
    B2, C2 = 13, 100
    k_logits2, k_targets2, key = jax.random.split(key, 3)
    logits2 = jax.random.normal(k_logits2, (B2, C2), dtype=jnp.float32)
    targets2 = jax.nn.relu(jax.random.normal(k_targets2, (B2, C2),
                                             dtype=jnp.float32))
    loss2 = weighted_softmax_loss(logits2, targets2)
    jax.block_until_ready(loss2)
    ref2 = _reference(logits2, targets2)
    assert jnp.allclose(loss2, ref2, rtol=1e-4, atol=1e-4), (loss2, ref2)

    print("KERNEL_OK")
</pallas_src>

<mosaic_0001>
module attributes {stable_mosaic.version = 11 : i64} {
  func.func @_weighted_softmax_loss_kernel(%arg0: i32, %arg1: memref<8x32xf32, #tpu.memory_space<vmem>>, %arg2: memref<8x32xf32, #tpu.memory_space<vmem>>, %arg3: memref<1x8x128xf32, #tpu.memory_space<vmem>>) attributes {dimension_semantics = [#tpu.dimension_semantics<parallel>], iteration_bounds = array<i64: 1>, scalar_prefetch = 0 : i64, scratch_operands = 0 : i64, tpu.core_type = #tpu.core_type<tc>, window_params = [{transform_indices = @transform_0, window_bounds = array<i64: 8, 32>}, {transform_indices = @transform_1, window_bounds = array<i64: 8, 32>}, {transform_indices = @transform_2, window_bounds = array<i64: 1, 8, 128>}]} {
    %c0 = arith.constant 0 : index
    %c0_0 = arith.constant 0 : index
    %0 = vector.load %arg1[%c0, %c0_0] : memref<8x32xf32, #tpu.memory_space<vmem>>, vector<8x32xf32>
    %c0_1 = arith.constant 0 : index
    %c0_2 = arith.constant 0 : index
    %1 = vector.load %arg2[%c0_1, %c0_2] : memref<8x32xf32, #tpu.memory_space<vmem>>, vector<8x32xf32>
    %cst = arith.constant dense<0.000000e+00> : vector<8xf32>
    %2 = vector.multi_reduction <add>, %1, %cst [1] : vector<8x32xf32> to vector<8xf32>
    %3 = vector.shape_cast %2 : vector<8xf32> to vector<8x1xf32>
    %cst_3 = arith.constant 0.000000e+00 : f32
    %4 = vector.broadcast %cst_3 : f32 to vector<8x1xf32>
    %5 = arith.cmpf oeq, %3, %4 : vector<8x1xf32>
    %cst_4 = arith.constant 9.99999997E-7 : f32
    %6 = vector.broadcast %cst_4 : f32 to vector<8x1xf32>
    %7 = arith.select %5, %6, %3 : vector<8x1xi1>, vector<8x1xf32>
    %cst_5 = arith.constant dense<0xFF800000> : vector<8xf32>
    %8 = vector.multi_reduction <maximumf>, %0, %cst_5 [1] : vector<8x32xf32> to vector<8xf32>
    %9 = vector.shape_cast %8 : vector<8xf32> to vector<8x1xf32>
    %10 = vector.broadcast %9 : vector<8x1xf32> to vector<8x32xf32>
    %11 = arith.subf %0, %10 : vector<8x32xf32>
    %12 = math.exp %11 : vector<8x32xf32>
    %cst_6 = arith.constant dense<0.000000e+00> : vector<8xf32>
    %13 = vector.multi_reduction <add>, %12, %cst_6 [1] : vector<8x32xf32> to vector<8xf32>
    %14 = vector.shape_cast %13 : vector<8xf32> to vector<8x1xf32>
    %15 = math.log %14 : vector<8x1xf32>
    %cst_7 = arith.constant 1.000000e-30 : f32
    %16 = vector.broadcast %cst_7 : f32 to vector<8x32xf32>
    %17 = arith.maximumf %1, %16 : vector<8x32xf32>
    %18 = math.log %17 : vector<8x32xf32>
    %19 = arith.subf %18, %11 : vector<8x32xf32>
    %20 = arith.mulf %1, %19 : vector<8x32xf32>
    %cst_8 = arith.constant dense<0.000000e+00> : vector<8xf32>
    %21 = vector.multi_reduction <add>, %20, %cst_8 [1] : vector<8x32xf32> to vector<8xf32>
    %22 = vector.shape_cast %21 : vector<8xf32> to vector<8x1xf32>
    %23 = math.log %7 : vector<8x1xf32>
    %24 = arith.subf %15, %23 : vector<8x1xf32>
    %25 = arith.mulf %3, %24 : vector<8x1xf32>
    %26 = arith.addf %22, %25 : vector<8x1xf32>
    %27 = vector.shape_cast %26 : vector<8x1xf32> to vector<1x8x1xf32>
    %cst_9 = arith.constant dense<0.000000e+00> : vector<1xf32>
    %28 = vector.multi_reduction <add>, %27, %cst_9 [1, 2] : vector<1x8x1xf32> to vector<1xf32>
    %29 = vector.shape_cast %28 : vector<1xf32> to vector<1x1x1xf32>
    %30 = vector.extract %29[0, 0, 0] : f32 from vector<1x1x1xf32>
    %31 = vector.broadcast %30 : f32 to vector<1x8x128xf32>
    %c0_10 = arith.constant 0 : index
    %c0_11 = arith.constant 0 : index
    %c0_12 = arith.constant 0 : index
    %32 = vector.load %arg3[%c0_10, %c0_11, %c0_12] : memref<1x8x128xf32, #tpu.memory_space<vmem>>, vector<1x8x128xf32>
    tpu.vector_store %arg3[%c0_10, %c0_11, %c0_12], %31 {strides = array<i32>} : memref<1x8x128xf32, #tpu.memory_space<vmem>>, vector<1x8x128xf32>,
    return
  }
  func.func @transform_0(%arg0: i32) -> (i32, i32) {
    %c0_i32 = arith.constant 0 : i32
    %c0_i32_0 = arith.constant 0 : i32
    return %arg0, %c0_i32 : i32, i32
  }
  func.func @transform_1(%arg0: i32) -> (i32, i32) {
    %c0_i32 = arith.constant 0 : i32
    %c0_i32_0 = arith.constant 0 : i32
    return %arg0, %c0_i32 : i32, i32
  }
  func.func @transform_2(%arg0: i32) -> (i32, i32, i32) {
    %c0_i32 = arith.constant 0 : i32
    %c0_i32_0 = arith.constant 0 : i32
    %c0_i32_1 = arith.constant 0 : i32
    return %arg0, %c0_i32, %c0_i32_0 : i32, i32, i32
  }
}

</mosaic_0001>

<bundles_post_ra>
// kernel: tpu_custom_call.1
= control target key start
LH: loop header
LB: loop body
LE: loop exit
PB: predicated region body
PF: predicated region fallthrough
CT: control target
= control target key end

     0   :  { %7 = vsyncpa [#allocation3], 0  ;;  %s207_s0 = inlined_call_operand.hbm [shape: f32[8,32], index: 0, kind: input, shape index: {}]   ;;  %s208_s1 = inlined_call_operand.hbm [shape: f32[8,32], index: 1, kind: input, shape index: {}]   ;;  %s209_s2 = inlined_call_operand.hbm [shape: f32[1,8,128], index: 2, kind: output, shape index: {}]  }
   0x1   :  { %8 = vsyncpa [#allocation6], 0 }
   0x2   :  { %9 = vsyncpa [#allocation4], 0  ;;  %s176_s9 = smov [#allocation2]   ;;  %s177_s11 = smov [#allocation5]  }
   0x3   :  { %s16_s10 = sshll.u32 %s176_s9, 4  ;;  %s26_s12 = sshll.u32 %s177_s11, 4  ;;  %s17_s10 = int_to_ptr.vmem [resolvable:$true] %s16_s10  ;;  %s27_s12 = int_to_ptr.vmem [resolvable:$true] %s26_s12 }
   0x4   :  { %s118_s13 = scalar_lea.vmem %s17_s10, 128  ;;  %p123_p1 = scmp.lt.s32.totalorder %s17_s10, %s17_s10 }
   0x5   :  { %p119_p0 = scmp.ne.s32.totalorder %s17_s10, %s118_s13  ;;  %p124_p2 = scmp.lt.s32.totalorder %s118_s13, %s118_s13 }
   0x7   :  { %p125_p3 = por %p124_p2, %p123_p1 }
   0x9   :  { %p126_p4 = pnand %p125_p3, %p119_p0 }
   0xb   :  { %129 = shalt.err (!%p126_p4)
}
   0xc   :  { %19 = dma.hbm_to_vmem [thread:$0]  %s207_s0, 128, %s17_s10, [#allocation3]  }
   0xd   :  { %s138_s16 = scalar_lea.vmem %s27_s12, 128  ;;  %p143_p6 = scmp.lt.s32.totalorder %s27_s12, %s27_s12 }
   0xe   :  { %p139_p5 = scmp.ne.s32.totalorder %s27_s12, %s138_s16  ;;  %p144_p7 = scmp.lt.s32.totalorder %s138_s16, %s138_s16 }
  0x10   :  { %p145_p8 = por %p144_p7, %p143_p6 }
  0x12   :  { %p146_p9 = pnand %p145_p8, %p139_p5 }
  0x14   :  { %149 = shalt.err (!%p146_p9)
}
  0x15   :  { %29 = dma.hbm_to_vmem [thread:$0]  %s208_s1, 128, %s27_s12, [#allocation6]  }
  0x16   :  { %170 = dma.done.wait [#allocation3], 128  }
  0x17   :  { %171 = vsyncadd [#allocation3], 4294967168 }
  0x18   :  { %172 = dma.done.wait [#allocation6], 128  }
  0x19   :  { %173 = vsyncadd [#allocation6], 4294967168  ;;  %vm38_vm0 = vcmask 261120   ;;  %v36_v0 = vld [vmem:[#allocation2] sm:$0xff]  ;;  %v37_v2 = vld [vmem:[#allocation5] sm:$0xff]  ;;  %vm68_vm2 = vcmask 7168  }
  0x1a   :  { %v44_v1 = vsel %vm38_vm0, %v36_v0, -inf  ;;  %v39_v3 = vsel %vm38_vm0, %v37_v2, 0.0  ;;  %v55_v4 = vmax.f32 %v37_v2, 1e-30  ;;  %s178_s0 = smov [#allocation7]  }
  0x1b   :  { %45 = vmax.xlane.f32.xlu0 %v44_v1  ;;  %s87_s1 = sshll.u32 %s178_s0, 4  ;;  %s88_s1 = int_to_ptr.vmem [resolvable:$true] %s87_s1 }
  0x1c   :  { %102 = vlog2.f32 %v55_v4  ;;  %s150_s20 = scalar_lea.vmem %s88_s1, 128  ;;  %p155_p11 = scmp.lt.s32.totalorder %s88_s1, %s88_s1 }
  0x1d   :  { %p151_p10 = scmp.ne.s32.totalorder %s88_s1, %s150_s20  ;;  %p156_p12 = scmp.lt.s32.totalorder %s150_s20, %s150_s20 }
  0x1f   :  { %40 = vadd.xlane.f32.xlu0 %v39_v3  ;;  %p157_p13 = por %p156_p12, %p155_p11 }
  0x21   :  { %p158_p0 = pnand %p157_p13, %p151_p10 }
  0x29   :  { %v103_v8 = vpop.eup %102 }
  0x2a   :  { %v57_v9 = vmul.f32 0.6931472, %v103_v8 }
  0xa4   :  { %v46_v5 = vpop.xlane.xlu0 %45 }
  0xa5   :  { %v47_v6 = vsub.f32 %v36_v0, %v46_v5 }
  0xa7   :  { %v48_v7 = vmul.f32 1.442695, %v47_v6  ;;  %v58_v10 = vsub.f32 %v57_v9, %v47_v6 }
  0xa8   :  { %v41_v15 = vpop.xlane.xlu0 %40 }
  0xa9   :  { %104 = vpow2.f32 %v48_v7  ;;  %v59_v13 = vmul.f32 %v58_v10, %v37_v2  ;;  %vm42_vm1 = vcmp.eq.f32.partialorder %v41_v15, 0.0 }
  0xaa   :  { %v43_v16 = vsel %vm42_vm1, 1e-06, %v41_v15 }
  0xab   :  { %v60_v14 = vsel %vm38_vm0, %v59_v13, 0.0  ;;  %106 = vlog2.f32 %v43_v16 }
  0xb6   :  { %v105_v11 = vpop.eup %104 }
  0xb7   :  { %v50_v12 = vsel %vm38_vm0, %v105_v11, 0.0 }
  0xb8   :  { %51 = vadd.xlane.f32.xlu1 %v50_v12  ;;  %v107_v18 = vpop.eup %106 }
  0xb9   :  { %v64_v19 = vmul.f32 0.6931472, %v107_v18 }
  0xbc   :  { %61 = vadd.xlane.f32.xlu1 %v60_v14 }
 0x141   :  { %v52_v17 = vpop.xlane.xlu1 %51 }
 0x142   :  { %108 = vlog2.f32 %v52_v17 }
 0x145   :  { %v62_v24 = vpop.xlane.xlu1 %61 }
 0x14f   :  { %v109_v20 = vpop.eup %108 }
 0x150   :  { %v54_v21 = vmul.f32 0.6931472, %v109_v20 }
 0x152   :  { %v65_v22 = vsub.f32 %v54_v21, %v64_v19 }
 0x154   :  { %v66_v23 = vmul.f32 %v65_v22, %v41_v15 }
 0x156   :  { %v67_v25 = vadd.f32 %v66_v23, %v62_v24 }
 0x158   :  { %v69_v26 = vsel %vm68_vm2, %v67_v25, 0.0 }
 0x159   :  { %70 = vadd.xlane.f32.xlu0 %v69_v26 }
 0x1e2   :  { %v71_v27 = vpop.xlane.xlu0 %70 }
 0x1e3   :  { %v72_v28 = vrot.slane %v71_v27, 4 }
 0x1e5   :  { %v73_v29 = vadd.f32 %v72_v28, %v71_v27 }
 0x1e7   :  { %v74_v30 = vrot.slane %v73_v29, 2 }
 0x1e9   :  { %v75_v31 = vadd.f32 %v74_v30, %v73_v29 }
 0x1eb   :  { %v76_v32 = vrot.slane %v75_v31, 1 }
 0x1ed   :  { %v77_v33 = vadd.f32 %v76_v32, %v75_v31 }
 0x1ef   :  { %97 = vpush %v77_v33 }
 0x220   :  { %s98_s19 = spop %97 }
 0x221   :  { %v79_v34 = vstv %s98_s19 }
 0x222   :  { %80 = vst [vmem:[#allocation7] sm:$0xff] %v79_v34 }
 0x223   :  { %161 = shalt.err (!%p158_p0)
}
 0x224   :  { %90 = dma.vmem_to_hbm [thread:$0]  %s88_s1, 128, %s209_s2, [#allocation4]  }
 0x225   :  { %174 = dma.done.wait [#allocation4], 128  }
 0x226   :  { %175 = vsyncadd [#allocation4], 4294967168 }
 0x227   :  { %94 = vsyncpa [#allocation3], 1 }
 0x228   :  { %95 = vsyncpa [#allocation6], 1 }
 0x229   :  { %96 = vsyncpa [#allocation4], 1 }

</bundles_post_ra>
